<compile_context>
chip_gen: v7x
topology: tpu7x:2x2x1
jax: 0.10.0
libtpu: 0.0.40
codegen_flags: <defaults>
</compile_context>

<pallas_src>
import functools

import jax
import jax.numpy as jnp
from jax.experimental import pallas as pl
from jax.experimental.pallas import tpu as pltpu


def _round_up(n, m):
    return ((n + m - 1) // m) * m


def _qnet_kernel(params_ref, x_ref, o_ref):
    # params (SMEM, f32[8]): [r, i, j, k, b0, b1, b2, b3]
    r = params_ref[0]
    qi = params_ref[1]
    qj = params_ref[2]
    qk = params_ref[3]
    b0 = params_ref[4]
    b1 = params_ref[5]
    b2 = params_ref[6]
    b3 = params_ref[7]

    # Batch-interleaved block: lane l of row m holds feature (l % 4) of batch
    # element m*32 + l//4.  Every vreg is fully populated.
    x = x_ref[...].astype(jnp.float32)            # (row_tile, 128)

    # Per-lane feature index f = lane % 4, built once at (1, 128) and
    # broadcast over sublanes (cheap, loop-invariant).
    f = jax.lax.broadcasted_iota(jnp.int32, (1, 128), 1) % 4

    def per_feature(v0, v1, v2, v3):
        # (1,128) row holding v_f on lanes whose feature index is f.
        return jnp.where(f == 0, v0,
               jnp.where(f == 1, v1,
               jnp.where(f == 2, v2, v3)))

    # Grouped (period-4) lane shift: G_s[l] = x[group(l), (f(l)+s) % 4].
    # Two full-lane rotates (XLU, otherwise-idle slot) + one select; the
    # wrapped-around lanes of each rotate are never selected.
    def grouped_shift(s):
        fwd = pltpu.roll(x, shift=128 - s, axis=1)    # lane l <- x[l + s]
        back = pltpu.roll(x, shift=4 - s, axis=1)     # lane l <- x[l + s - 4]
        return jnp.where(f + s < 4, fwd, back)

    # Hamilton matrix (column f is the weight vector of output feature f):
    #   W = [[ r,  i,  j,  k],
    #        [-i,  r,  k, -j],
    #        [-j, -k,  r,  i],
    #        [-k,  j, -i,  r]]
    # In lane space:  y = W[f,f]*x + sum_{s=1..3} C_s * G_s,  C_s[f] = W[(f+s)%4, f].
    c1 = per_feature(-qi, -qk, -qi, qk)
    c2 = per_feature(-qj, qj, qj, -qj)
    c3 = per_feature(-qk, qi, qk, qi)
    blane = per_feature(b0, b1, b2, b3)

    y = (r * x
         + c1 * grouped_shift(1)
         + c2 * grouped_shift(2)
         + c3 * grouped_shift(3)
         + blane)

    # sigmoid(y) == 0.5*tanh(y/2) + 0.5  -> EUP, overflow-free.
    o_ref[...] = (0.5 * jnp.tanh(0.5 * y) + 0.5).astype(o_ref.dtype)


@functools.partial(jax.jit, static_argnames=("max_rows_per_block",))
def qnet_forward(x, r, i, j, k, bias, *, max_rows_per_block=1024):
    """x: (B, 4); r,i,j,k: (1,1); bias: (4,)  ->  (B, 4), same dtype as x."""
    B, fin = x.shape
    assert fin == 4, fin
    out_dtype = x.dtype

    # Scalar parameter block for SMEM: [r, i, j, k, b0..b3].
    params = jnp.concatenate([
        jnp.stack([r.reshape(()), i.reshape(()), j.reshape(()), k.reshape(())]),
        bias.reshape(4),
    ]).astype(jnp.float32)

    # Pack 32 batch elements per 128-lane row.  This is a *free* row-major
    # reshape (no transpose pass); pad only to a multiple of 32 when needed.
    rows = -(-B // 32)
    b_pad = rows * 32
    if b_pad != B:
        x = jnp.pad(x, ((0, b_pad - B), (0, 0)))
    xr = x.reshape(rows, 128)

    # Row tiling: big (<=512 KiB) blocks, >=2 grid steps when rows allow
    # (megacore sharding on v7x); ragged last block is masked by Pallas.
    if rows <= 8:
        row_tile = rows                       # full-array block
    else:
        row_tile = min(max_rows_per_block, _round_up(-(-rows // 2), 8))
    grid = (pl.cdiv(rows, row_tile),)

    out = pl.pallas_call(
        _qnet_kernel,
        out_shape=jax.ShapeDtypeStruct((rows, 128), out_dtype),
        grid_spec=pl.GridSpec(
            grid=grid,
            in_specs=[
                pl.BlockSpec(memory_space=pltpu.MemorySpace.SMEM),   # params
                pl.BlockSpec((row_tile, 128), lambda n: (n, 0)),     # x block
            ],
            out_specs=pl.BlockSpec((row_tile, 128), lambda n: (n, 0)),
        ),
        compiler_params=pltpu.CompilerParams(
            dimension_semantics=("parallel",)),
    )(params, xr)

    out = out.reshape(b_pad, 4)                # free reshape back
    if b_pad != B:
        out = out[:B]
    return out


# ----- plain-JAX reference (mirrors QuaternionLinear's torch.cat build) -----
def make_quaternion_weight(r, i, j, k):
    col_r = jnp.concatenate([r, -i, -j, -k], axis=0)
    col_i = jnp.concatenate([i, r, -k, j], axis=0)
    col_j = jnp.concatenate([j, k, r, -i], axis=0)
    col_k = jnp.concatenate([k, -j, i, r], axis=0)
    return jnp.concatenate([col_r, col_i, col_j, col_k], axis=1)  # (4, 4)


def reference_forward(x, r, i, j, k, bias):
    w = make_quaternion_weight(r, i, j, k)
    return jax.nn.sigmoid(x @ w + bias[None, :])


if __name__ == "__main__":
    key = jax.random.PRNGKey(0)
    k_x, k_r, k_i, k_j, k_k, k_b, k_x2, k_x3 = jax.random.split(key, 8)

    # 4-bit parity style input: all 16 combinations of 4 bits (+ tiny noise).
    B = 16
    bits = jnp.array(
        [[(n >> b) & 1 for b in range(4)] for n in range(B)],
        dtype=jnp.float32)
    x = bits + 0.01 * jax.random.normal(k_x, (B, 4), dtype=jnp.float32)

    # Quaternion-linear parameters: r,i,j,k each (in_q, out_q) = (1, 1).
    r = jax.random.normal(k_r, (1, 1), dtype=jnp.float32)
    i = jax.random.normal(k_i, (1, 1), dtype=jnp.float32)
    j = jax.random.normal(k_j, (1, 1), dtype=jnp.float32)
    k = jax.random.normal(k_k, (1, 1), dtype=jnp.float32)
    bias = jax.random.normal(k_b, (4,), dtype=jnp.float32)

    # Small (single-block) case.
    out = jax.block_until_ready(qnet_forward(x, r, i, j, k, bias))
    ref = reference_forward(x, r, i, j, k, bias)
    assert out.shape == (B, 4), out.shape
    assert jnp.allclose(out, ref, atol=1e-5, rtol=1e-5), (
        f"max err {jnp.max(jnp.abs(out - ref))}")

    # Ragged multi-block case: rows=19 -> 2 blocks of 16 rows, last ragged.
    B2 = 600
    x2 = jax.random.normal(k_x2, (B2, 4), dtype=jnp.float32)
    out2 = jax.block_until_ready(qnet_forward(x2, r, i, j, k, bias))
    ref2 = reference_forward(x2, r, i, j, k, bias)
    assert out2.shape == (B2, 4), out2.shape
    assert jnp.allclose(out2, ref2, atol=1e-5, rtol=1e-5), (
        f"max err {jnp.max(jnp.abs(out2 - ref2))}")

    # Large, even multi-block case: rows=4096 -> 4 blocks of 1024 rows.
    B3 = 131072
    x3 = jax.random.normal(k_x3, (B3, 4), dtype=jnp.float32)
    out3 = jax.block_until_ready(qnet_forward(x3, r, i, j, k, bias))
    ref3 = reference_forward(x3, r, i, j, k, bias)
    assert out3.shape == (B3, 4), out3.shape
    assert jnp.allclose(out3, ref3, atol=1e-5, rtol=1e-5), (
        f"max err {jnp.max(jnp.abs(out3 - ref3))}")

    print("KERNEL_OK")
</pallas_src>

<mosaic_0001>
module attributes {stable_mosaic.version = 11 : i64} {
  func.func @_qnet_kernel(%arg0: i32, %arg1: memref<8xf32, #tpu.memory_space<smem>>, %arg2: memref<1x128xf32, #tpu.memory_space<vmem>>, %arg3: memref<1x128xf32, #tpu.memory_space<vmem>>) attributes {dimension_semantics = [#tpu.dimension_semantics<parallel>], iteration_bounds = array<i64: 1>, scalar_prefetch = 0 : i64, scratch_operands = 0 : i64, tpu.core_type = #tpu.core_type<tc>, window_params = [{transform_indices = @transform_0, window_bounds = array<i64: 8>}, {transform_indices = @transform_1, window_bounds = array<i64: 1, 128>}, {transform_indices = @transform_2, window_bounds = array<i64: 1, 128>}]} {
    %c0 = arith.constant 0 : index
    %0 = memref.load %arg1[%c0] : memref<8xf32, #tpu.memory_space<smem>>
    %c1 = arith.constant 1 : index
    %1 = memref.load %arg1[%c1] : memref<8xf32, #tpu.memory_space<smem>>
    %c2 = arith.constant 2 : index
    %2 = memref.load %arg1[%c2] : memref<8xf32, #tpu.memory_space<smem>>
    %c3 = arith.constant 3 : index
    %3 = memref.load %arg1[%c3] : memref<8xf32, #tpu.memory_space<smem>>
    %c4 = arith.constant 4 : index
    %4 = memref.load %arg1[%c4] : memref<8xf32, #tpu.memory_space<smem>>
    %c5 = arith.constant 5 : index
    %5 = memref.load %arg1[%c5] : memref<8xf32, #tpu.memory_space<smem>>
    %c6 = arith.constant 6 : index
    %6 = memref.load %arg1[%c6] : memref<8xf32, #tpu.memory_space<smem>>
    %c7 = arith.constant 7 : index
    %7 = memref.load %arg1[%c7] : memref<8xf32, #tpu.memory_space<smem>>
    %c0_0 = arith.constant 0 : index
    %c0_1 = arith.constant 0 : index
    %8 = vector.load %arg2[%c0_0, %c0_1] : memref<1x128xf32, #tpu.memory_space<vmem>>, vector<1x128xf32>
    %9 = tpu.iota {dimensions = array<i32: 1>} : vector<1x128xi32>
    %c4_i32 = arith.constant 4 : i32
    %c0_i32 = arith.constant 0 : i32
    %10 = arith.cmpi eq, %c4_i32, %c0_i32 : i32
    %c1_i32 = arith.constant 1 : i32
    %11 = arith.select %10, %c1_i32, %c4_i32 : i32
    %12 = vector.broadcast %11 : i32 to vector<1x128xi32>
    %13 = arith.remsi %9, %12 : vector<1x128xi32>
    %c0_i32_2 = arith.constant 0 : i32
    %14 = vector.broadcast %c0_i32_2 : i32 to vector<1x128xi32>
    %15 = arith.cmpi ne, %13, %14 : vector<1x128xi32>
    %c0_i32_3 = arith.constant 0 : i32
    %16 = vector.broadcast %c0_i32_3 : i32 to vector<1x128xi32>
    %17 = arith.cmpi slt, %13, %16 : vector<1x128xi32>
    %c0_i32_4 = arith.constant 0 : i32
    %18 = arith.cmpi slt, %11, %c0_i32_4 : i32
    %19 = vector.broadcast %18 : i1 to vector<1x128xi1>
    %20 = vector.broadcast %19 : vector<1x128xi1> to vector<1x128xi1>
    %21 = arith.xori %17, %20 : vector<1x128xi1>
    %22 = arith.andi %21, %15 : vector<1x128xi1>
    %23 = vector.broadcast %11 : i32 to vector<1x128xi32>
    %24 = arith.addi %13, %23 : vector<1x128xi32>
    %25 = arith.select %22, %24, %13 : vector<1x128xi1>, vector<1x128xi32>
    %cst = arith.constant 0.000000e+00 : f32
    %26 = arith.subf %cst, %1 : f32
    %cst_5 = arith.constant 0.000000e+00 : f32
    %27 = arith.subf %cst_5, %3 : f32
    %cst_6 = arith.constant 0.000000e+00 : f32
    %28 = arith.subf %cst_6, %1 : f32
    %c0_i32_7 = arith.constant 0 : i32
    %29 = vector.broadcast %c0_i32_7 : i32 to vector<1x128xi32>
    %30 = arith.cmpi eq, %25, %29 : vector<1x128xi32>
    %c1_i32_8 = arith.constant 1 : i32
    %31 = vector.broadcast %c1_i32_8 : i32 to vector<1x128xi32>
    %32 = arith.cmpi eq, %25, %31 : vector<1x128xi32>
    %c2_i32 = arith.constant 2 : i32
    %33 = vector.broadcast %c2_i32 : i32 to vector<1x128xi32>
    %34 = arith.cmpi eq, %25, %33 : vector<1x128xi32>
    %35 = vector.broadcast %28 : f32 to vector<1x128xf32>
    %36 = vector.broadcast %3 : f32 to vector<1x128xf32>
    %37 = arith.select %34, %35, %36 : vector<1x128xi1>, vector<1x128xf32>
    %38 = vector.broadcast %27 : f32 to vector<1x128xf32>
    %39 = arith.select %32, %38, %37 : vector<1x128xi1>, vector<1x128xf32>
    %40 = vector.broadcast %26 : f32 to vector<1x128xf32>
    %41 = arith.select %30, %40, %39 : vector<1x128xi1>, vector<1x128xf32>
    %cst_9 = arith.constant 0.000000e+00 : f32
    %42 = arith.subf %cst_9, %2 : f32
    %cst_10 = arith.constant 0.000000e+00 : f32
    %43 = arith.subf %cst_10, %2 : f32
    %c0_i32_11 = arith.constant 0 : i32
    %44 = vector.broadcast %c0_i32_11 : i32 to vector<1x128xi32>
    %45 = arith.cmpi eq, %25, %44 : vector<1x128xi32>
    %c1_i32_12 = arith.constant 1 : i32
    %46 = vector.broadcast %c1_i32_12 : i32 to vector<1x128xi32>
    %47 = arith.cmpi eq, %25, %46 : vector<1x128xi32>
    %c2_i32_13 = arith.constant 2 : i32
    %48 = vector.broadcast %c2_i32_13 : i32 to vector<1x128xi32>
    %49 = arith.cmpi eq, %25, %48 : vector<1x128xi32>
    %50 = vector.broadcast %2 : f32 to vector<1x128xf32>
    %51 = vector.broadcast %43 : f32 to vector<1x128xf32>
    %52 = arith.select %49, %50, %51 : vector<1x128xi1>, vector<1x128xf32>
    %53 = vector.broadcast %2 : f32 to vector<1x128xf32>
    %54 = arith.select %47, %53, %52 : vector<1x128xi1>, vector<1x128xf32>
    %55 = vector.broadcast %42 : f32 to vector<1x128xf32>
    %56 = arith.select %45, %55, %54 : vector<1x128xi1>, vector<1x128xf32>
    %cst_14 = arith.constant 0.000000e+00 : f32
    %57 = arith.subf %cst_14, %3 : f32
    %c0_i32_15 = arith.constant 0 : i32
    %58 = vector.broadcast %c0_i32_15 : i32 to vector<1x128xi32>
    %59 = arith.cmpi eq, %25, %58 : vector<1x128xi32>
    %c1_i32_16 = arith.constant 1 : i32
    %60 = vector.broadcast %c1_i32_16 : i32 to vector<1x128xi32>
    %61 = arith.cmpi eq, %25, %60 : vector<1x128xi32>
    %c2_i32_17 = arith.constant 2 : i32
    %62 = vector.broadcast %c2_i32_17 : i32 to vector<1x128xi32>
    %63 = arith.cmpi eq, %25, %62 : vector<1x128xi32>
    %64 = vector.broadcast %3 : f32 to vector<1x128xf32>
    %65 = vector.broadcast %1 : f32 to vector<1x128xf32>
    %66 = arith.select %63, %64, %65 : vector<1x128xi1>, vector<1x128xf32>
    %67 = vector.broadcast %1 : f32 to vector<1x128xf32>
    %68 = arith.select %61, %67, %66 : vector<1x128xi1>, vector<1x128xf32>
    %69 = vector.broadcast %57 : f32 to vector<1x128xf32>
    %70 = arith.select %59, %69, %68 : vector<1x128xi1>, vector<1x128xf32>
    %c0_i32_18 = arith.constant 0 : i32
    %71 = vector.broadcast %c0_i32_18 : i32 to vector<1x128xi32>
    %72 = arith.cmpi eq, %25, %71 : vector<1x128xi32>
    %c1_i32_19 = arith.constant 1 : i32
    %73 = vector.broadcast %c1_i32_19 : i32 to vector<1x128xi32>
    %74 = arith.cmpi eq, %25, %73 : vector<1x128xi32>
    %c2_i32_20 = arith.constant 2 : i32
    %75 = vector.broadcast %c2_i32_20 : i32 to vector<1x128xi32>
    %76 = arith.cmpi eq, %25, %75 : vector<1x128xi32>
    %77 = vector.broadcast %6 : f32 to vector<1x128xf32>
    %78 = vector.broadcast %7 : f32 to vector<1x128xf32>
    %79 = arith.select %76, %77, %78 : vector<1x128xi1>, vector<1x128xf32>
    %80 = vector.broadcast %5 : f32 to vector<1x128xf32>
    %81 = arith.select %74, %80, %79 : vector<1x128xi1>, vector<1x128xf32>
    %82 = vector.broadcast %4 : f32 to vector<1x128xf32>
    %83 = arith.select %72, %82, %81 : vector<1x128xi1>, vector<1x128xf32>
    %84 = vector.broadcast %0 : f32 to vector<1x128xf32>
    %85 = arith.mulf %84, %8 : vector<1x128xf32>
    %c127_i32 = arith.constant 127 : i32
    %86 = tpu.dynamic_rotate %8 by %c127_i32 dim 1 : vector<1x128xf32>, i32 -> vector<1x128xf32>
    %c3_i32 = arith.constant 3 : i32
    %87 = tpu.dynamic_rotate %8 by %c3_i32 dim 1 : vector<1x128xf32>, i32 -> vector<1x128xf32>
    %c1_i32_21 = arith.constant 1 : i32
    %88 = vector.broadcast %c1_i32_21 : i32 to vector<1x128xi32>
    %89 = arith.addi %25, %88 : vector<1x128xi32>
    %c4_i32_22 = arith.constant 4 : i32
    %90 = vector.broadcast %c4_i32_22 : i32 to vector<1x128xi32>
    %91 = arith.cmpi slt, %89, %90 : vector<1x128xi32>
    %92 = arith.select %91, %86, %87 : vector<1x128xi1>, vector<1x128xf32>
    %93 = arith.mulf %41, %92 : vector<1x128xf32>
    %94 = arith.addf %85, %93 : vector<1x128xf32>
    %c126_i32 = arith.constant 126 : i32
    %95 = tpu.dynamic_rotate %8 by %c126_i32 dim 1 : vector<1x128xf32>, i32 -> vector<1x128xf32>
    %c2_i32_23 = arith.constant 2 : i32
    %96 = tpu.dynamic_rotate %8 by %c2_i32_23 dim 1 : vector<1x128xf32>, i32 -> vector<1x128xf32>
    %c2_i32_24 = arith.constant 2 : i32
    %97 = vector.broadcast %c2_i32_24 : i32 to vector<1x128xi32>
    %98 = arith.addi %25, %97 : vector<1x128xi32>
    %c4_i32_25 = arith.constant 4 : i32
    %99 = vector.broadcast %c4_i32_25 : i32 to vector<1x128xi32>
    %100 = arith.cmpi slt, %98, %99 : vector<1x128xi32>
    %101 = arith.select %100, %95, %96 : vector<1x128xi1>, vector<1x128xf32>
    %102 = arith.mulf %56, %101 : vector<1x128xf32>
    %103 = arith.addf %94, %102 : vector<1x128xf32>
    %c125_i32 = arith.constant 125 : i32
    %104 = tpu.dynamic_rotate %8 by %c125_i32 dim 1 : vector<1x128xf32>, i32 -> vector<1x128xf32>
    %c1_i32_26 = arith.constant 1 : i32
    %105 = tpu.dynamic_rotate %8 by %c1_i32_26 dim 1 : vector<1x128xf32>, i32 -> vector<1x128xf32>
    %c3_i32_27 = arith.constant 3 : i32
    %106 = vector.broadcast %c3_i32_27 : i32 to vector<1x128xi32>
    %107 = arith.addi %25, %106 : vector<1x128xi32>
    %c4_i32_28 = arith.constant 4 : i32
    %108 = vector.broadcast %c4_i32_28 : i32 to vector<1x128xi32>
    %109 = arith.cmpi slt, %107, %108 : vector<1x128xi32>
    %110 = arith.select %109, %104, %105 : vector<1x128xi1>, vector<1x128xf32>
    %111 = arith.mulf %70, %110 : vector<1x128xf32>
    %112 = arith.addf %103, %111 : vector<1x128xf32>
    %113 = arith.addf %112, %83 : vector<1x128xf32>
    %cst_29 = arith.constant 5.000000e-01 : f32
    %114 = vector.broadcast %cst_29 : f32 to vector<1x128xf32>
    %115 = arith.mulf %114, %113 : vector<1x128xf32>
    %116 = math.tanh %115 : vector<1x128xf32>
    %cst_30 = arith.constant 5.000000e-01 : f32
    %117 = vector.broadcast %cst_30 : f32 to vector<1x128xf32>
    %118 = arith.mulf %117, %116 : vector<1x128xf32>
    %cst_31 = arith.constant 5.000000e-01 : f32
    %119 = vector.broadcast %cst_31 : f32 to vector<1x128xf32>
    %120 = arith.addf %118, %119 : vector<1x128xf32>
    %c0_32 = arith.constant 0 : index
    %c0_33 = arith.constant 0 : index
    %121 = vector.load %arg3[%c0_32, %c0_33] : memref<1x128xf32, #tpu.memory_space<vmem>>, vector<1x128xf32>
    tpu.vector_store %arg3[%c0_32, %c0_33], %120 {strides = array<i32>} : memref<1x128xf32, #tpu.memory_space<vmem>>, vector<1x128xf32>,
    return
  }
  func.func @transform_0(%arg0: i32) -> i32 {
    %c0_i32 = arith.constant 0 : i32
    %c0_i32_0 = arith.constant 0 : i32
    return %c0_i32 : i32
  }
  func.func @transform_1(%arg0: i32) -> (i32, i32) {
    %c0_i32 = arith.constant 0 : i32
    %c0_i32_0 = arith.constant 0 : i32
    return %arg0, %c0_i32 : i32, i32
  }
  func.func @transform_2(%arg0: i32) -> (i32, i32) {
    %c0_i32 = arith.constant 0 : i32
    %c0_i32_0 = arith.constant 0 : i32
    return %arg0, %c0_i32 : i32, i32
  }
}

</mosaic_0001>

<bundles_post_ra>
// kernel: qnet_forward.1
= control target key start
LH: loop header
LB: loop body
LE: loop exit
PB: predicated region body
PF: predicated region fallthrough
CT: control target
= control target key end

     0   :  { %7 = vsyncpa [#allocation3], 0  ;;  %s211_s0 = inlined_call_operand.vmem [shape: f32[8], index: 0, kind: input, shape index: {}]   ;;  %s212_s1 = inlined_call_operand.vmem [shape: f32[1,128], index: 1, kind: input, shape index: {}]   ;;  %s213_s2 = inlined_call_operand.vmem [shape: f32[1,128], index: 2, kind: output, shape index: {}]  }
   0x1   :  { %s14_s11 = sshll.u32 %s211_s0, 4  ;;  %s15_s11 = int_to_ptr.vmem [resolvable:$true] %s14_s11 }
   0x2   :  { %s131_s12 = scalar_lea.vmem %s15_s11, 16  ;;  %p136_p1 = scmp.lt.s32.totalorder %s15_s11, %s15_s11 }
   0x3   :  { %p132_p0 = scmp.ne.s32.totalorder %s15_s11, %s131_s12  ;;  %p137_p2 = scmp.lt.s32.totalorder %s131_s12, %s131_s12 }
   0x5   :  { %p138_p3 = por %p137_p2, %p136_p1 }
   0x7   :  { %p139_p4 = pnand %p138_p3, %p132_p0 }
   0x9   :  { %142 = shalt.err (!%p139_p4)
}
   0xa   :  { %s145_s13 = smov [#allocation2]  }
   0xb   :  { %17 = dma.vmem_to_smem %s15_s11, 16, %s145_s13, [#allocation3]  }
   0xc   :  { %143 = dma.done.wait [#allocation3], 16  }
   0xd   :  { %144 = vsyncadd [#allocation3], 4294967280 }
   0xe   :  { %23 = sfence }
   0xf   :  { %v32_v0 = vld [vmem:[%s212_s1] sm:$0x1]  ;;  %s146_s16 = smov 126   ;;  %s147_s0 = smov 127   ;;  %v33_v1 = vlaneseq }
  0x10   :  { %86 = vrot.lane.b32.xlu1 %v32_v0, %s146_s16  ;;  %77 = vrot.lane.b32.xlu0 %v32_v0, %s147_s0  ;;  %s148_s17 = smov 2   ;;  %s149_s18 = smov 3  }
  0x11   :  { %s150_s19 = smov 1   ;;  %s151_s20 = smov 125   ;;  %v34_v2 = vand.u32 127, %v33_v1 }
  0x12   :  { %s173_s21 = sld [smem:[#allocation2 + $0x1]]  ;;  %s175_s22 = sld [smem:[#allocation2 + $0x2]] }
  0x13   :  { %s117_s1 = sld [smem:[#allocation2 + $0x3]]  ;;  %v39_v3 = vand.u32 3, %v34_v2  ;;  %s179_s25 = sld [smem:[#allocation2]] }
  0x14   :  { %88 = vrot.lane.b32.xlu1 %v32_v0, %s148_s17  ;;  %79 = vrot.lane.b32.xlu0 %v32_v0, %s149_s18  ;;  %s181_s27 = sld [smem:[#allocation2 + $0x6]]  ;;  %s183_s28 = sld [smem:[#allocation2 + $0x7]] }
  0x15   :  { %vm51_vm0 = vcmp.eq.s32.totalorder %v39_v3, 2  ;;  %s186_s29 = sld [smem:[#allocation2 + $0x5]]  ;;  %vm50_vm1 = vcmp.eq.s32.totalorder %v39_v3, 1  ;;  %v90_v8 = vadd.s32 2, %v39_v3  ;;  %v81_v11 = vadd.s32 1, %v39_v3  ;;  %s192_s30 = sld [smem:[#allocation2 + $0x4]] }
  0x16   :  { %vm49_vm2 = vcmp.eq.s32.totalorder %v39_v3, 0  ;;  %v99_v18 = vadd.s32 3, %v39_v3 }
  0x17   :  { %vm91_vm3 = vcmp.lt.s32.totalorder %v90_v8, 4  ;;  %vm82_vm4 = vcmp.lt.s32.totalorder %v81_v11, 4 }
  0x18   :  { %97 = vrot.lane.b32.xlu1 %v32_v0, %s150_s19  ;;  %95 = vrot.lane.b32.xlu0 %v32_v0, %s151_s20  ;;  %s47_s23 = ssub.f32 0.0, %s173_s21  ;;  %v59_v6 = vstv %s175_s22  ;;  %v64_v12 = vstv %s173_s21  ;;  %vm100_vm5 = vcmp.lt.s32.totalorder %v99_v18, 4 }
  0x19   :  { %s58_s24 = ssub.f32 0.0, %s175_s22  ;;  %v53_v5 = vstv %s117_s1  ;;  %v75_v17 = vstv %s179_s25 }
  0x1a   :  { %s48_s26 = ssub.f32 0.0, %s117_s1  ;;  %v52_v4 = vstv %s47_s23  ;;  %v65_v19 = vsel %vm51_vm0, %v53_v5, %v64_v12  ;;  %v68_v21 = vstv %s181_s27  ;;  %v69_v22 = vstv %s183_s28 }
  0x1b   :  { %v60_v7 = vstv %s58_s24  ;;  %v54_v9 = vsel %vm51_vm0, %v52_v4, %v53_v5  ;;  %v76_v26 = vmul.f32 %v75_v17, %v32_v0  ;;  %v66_v27 = vsel %vm50_vm1, %v64_v12, %v65_v19 }
  0x1c   :  { %v55_v10 = vstv %s48_s26  ;;  %v61_v13 = vsel %vm51_vm0, %v59_v6, %v60_v7  ;;  %v71_v28 = vstv %s186_s29  ;;  %v70_v32 = vsel %vm51_vm0, %v68_v21, %v69_v22 }
  0x1d   :  { %v56_v16 = vsel %vm50_vm1, %v55_v10, %v54_v9  ;;  %v62_v20 = vsel %vm50_vm1, %v59_v6, %v61_v13  ;;  %v67_v34 = vsel %vm49_vm2, %v55_v10, %v66_v27  ;;  %v72_v39 = vsel %vm50_vm1, %v71_v28, %v70_v32 }
  0x1e   :  { %v57_v23 = vsel %vm49_vm2, %v52_v4, %v56_v16  ;;  %v63_v29 = vsel %vm49_vm2, %v60_v7, %v62_v20  ;;  %v73_v40 = vstv %s192_s30 }
  0x1f   :  { %v74_v44 = vsel %vm49_vm2, %v73_v40, %v72_v39 }
  0x82   :  { %v87_v14 = vpop.permute.xlu1 %86  ;;  %v78_v15 = vpop.permute.xlu0 %77 }
  0x86   :  { %v89_v24 = vpop.permute.xlu1 %88  ;;  %v80_v25 = vpop.permute.xlu0 %79 }
  0x87   :  { %v92_v30 = vsel %vm91_vm3, %v87_v14, %v89_v24  ;;  %v83_v31 = vsel %vm82_vm4, %v78_v15, %v80_v25 }
  0x88   :  { %v84_v33 = vmul.f32 %v83_v31, %v57_v23  ;;  %v93_v35 = vmul.f32 %v92_v30, %v63_v29 }
  0x8a   :  { %v85_v36 = vadd.f32 %v84_v33, %v76_v26  ;;  %v98_v37 = vpop.permute.xlu1 %97  ;;  %v96_v38 = vpop.permute.xlu0 %95 }
  0x8b   :  { %v101_v41 = vsel %vm100_vm5, %v96_v38, %v98_v37 }
  0x8c   :  { %v94_v42 = vadd.f32 %v93_v35, %v85_v36  ;;  %v102_v43 = vmul.f32 %v101_v41, %v67_v34 }
  0x8e   :  { %v103_v45 = vadd.f32 %v102_v43, %v94_v42 }
  0x90   :  { %v104_v46 = vadd.f32 %v103_v45, %v74_v44 }
  0x92   :  { %v105_v47 = vmul.f32 0.5, %v104_v46 }
  0x94   :  { %129 = vtanh.f32 %v105_v47 }
  0x9e   :  { %v130_v48 = vpop.eup %129 }
  0x9f   :  { %v107_v49 = vmul.f32 0.5, %v130_v48 }
  0xa1   :  { %v108_v50 = vadd.f32 0.5, %v107_v49 }
  0xa3   :  { %109 = vst [vmem:[%s213_s2] sm:$0x1] %v108_v50 }
  0xa4   :  { %114 = vsyncpa [#allocation3], 1 }

</bundles_post_ra>
